<compile_context>
chip_gen: v5e
topology: v5e:2x2
jax: 0.10.0
libtpu: 0.0.40
codegen_flags: <defaults>
</compile_context>

<pallas_src>
import functools

import numpy as np
import jax
import jax.numpy as jnp
from jax.experimental import pallas as pl
from jax.experimental.pallas import tpu as pltpu

# Per-buffer tile cap.  Input + output, each double-buffered => ~4x this live
# in VMEM (16 MiB), safely under the 32 MiB scoped limit requested below and
# under every generation's physical VMEM (v7x 64 MiB, v5e/v6e 128 MiB).
_DEFAULT_MAX_TILE_BYTES = 4 * 1024 * 1024
# Only split a table that already fits in one block if it is big enough that
# streaming it on both v7x TensorCores beats one extra grid step.
_MEGACORE_SPLIT_BYTES = 2 * 1024 * 1024
_VMEM_LIMIT_BYTES = 32 * 1024 * 1024


def _copy_kernel(emb_ref, out_ref):
    # Materialize the embedding tile into the output (unmasked, lane-dense).
    out_ref[...] = emb_ref[...]


def _sublane_quantum(dtype):
    # Block rows must be a multiple of the sublane packing (8 for 4-byte,
    # 16 for 2-byte, 32 for 1-byte dtypes) unless the block spans the full dim.
    return max(8, 32 // jnp.dtype(dtype).itemsize)


def _pick_tile_rows(index_dim, num_channel, dtype, max_tile_bytes):
    row_bytes = num_channel * jnp.dtype(dtype).itemsize
    sub = _sublane_quantum(dtype)
    table_bytes = index_dim * row_bytes

    if table_bytes <= max_tile_bytes:
        # Whole table fits in a single block.  For large tables that split
        # cleanly, use two blocks so the "parallel" grid axis can be sharded
        # across v7x's two TensorCores.
        if table_bytes >= _MEGACORE_SPLIT_BYTES and index_dim % (2 * sub) == 0:
            return index_dim // 2
        return index_dim

    # Largest multiple-of-`sub` row count fitting the per-buffer budget.
    budget_rows = max(sub, (max_tile_bytes // row_bytes) // sub * sub)
    if index_dim % sub == 0:
        # Prefer an exact divisor: every block is a full, unmasked store.
        t = budget_rows
        while t >= sub:
            if index_dim % t == 0:
                return t
            t -= sub
    # Fall back to cdiv tiling (only the trailing block is masked).
    return budget_rows


def trainable_position_encoding_forward(position_embeddings, *,
                                        tile_rows=None,
                                        max_tile_bytes=_DEFAULT_MAX_TILE_BYTES,
                                        alias_input=False):
    """Pallas materialization of TrainablePositionEncoding.forward().

    Args:
      position_embeddings: (index_dim, num_channel) parameter table.
      tile_rows: optional row-tile override; rounded to the sublane quantum.
      max_tile_bytes: per-buffer VMEM budget used to auto-pick the row tile.
      alias_input: if True, request input_output_aliases={0: 0} so a donated
        input buffer is written in place (pair with jit donate_argnums).

    Returns:
      (index_dim, num_channel) array equal to the parameter, same dtype.
    """
    index_dim, num_channel = position_embeddings.shape
    dtype = position_embeddings.dtype
    sub = _sublane_quantum(dtype)

    if tile_rows is None:
        tile_rows = _pick_tile_rows(index_dim, num_channel, dtype,
                                    max_tile_bytes)
    else:
        # Guard the (8, 128) block constraint for caller-supplied tiles.
        tile_rows = int(tile_rows)
        if tile_rows >= index_dim:
            tile_rows = index_dim              # full extent is always legal
        else:
            tile_rows = max(sub, (tile_rows // sub) * sub)

    grid = (pl.cdiv(index_dim, tile_rows),)

    extra = {}
    if alias_input:
        extra["input_output_aliases"] = {0: 0}

    return pl.pallas_call(
        _copy_kernel,
        out_shape=jax.ShapeDtypeStruct((index_dim, num_channel), dtype),
        grid=grid,
        # Last dim kept full-extent (num_channel multiple of 128 in practice)
        # for unmasked, lane-dense vst; rows are sublane-aligned.
        in_specs=[pl.BlockSpec((tile_rows, num_channel), lambda i: (i, 0))],
        out_specs=pl.BlockSpec((tile_rows, num_channel), lambda i: (i, 0)),
        compiler_params=pltpu.CompilerParams(
            dimension_semantics=("parallel",),
            vmem_limit_bytes=_VMEM_LIMIT_BYTES),
        **extra,
    )(position_embeddings)


class TrainablePositionEncodingJAX:
    """JAX/Pallas port of the PyTorch TrainablePositionEncoding module."""

    def __init__(self, index_dims, num_channel=128, key=None):
        self._num_channel = num_channel
        self._index_dims = index_dims
        index_dim = int(np.prod(index_dims))
        if key is None:
            key = jax.random.PRNGKey(0)
        # Stands in for torch.randn(index_dim, num_channel).
        self.position_embeddings = jax.random.normal(
            key, (index_dim, num_channel), dtype=jnp.float32)

    @property
    def num_dimensions(self) -> int:
        if isinstance(self._index_dims, int):
            return 1
        return len(self._index_dims)

    def output_size(self) -> int:
        return self._num_channel

    def __call__(self, pos=None, *, materialize=True):
        # `pos` is ignored, matching the PyTorch forward semantics.
        if not materialize:
            # Optimal path: forward() is an identity on the parameter, so
            # simply return it -- zero HBM traffic, no kernel.
            return self.position_embeddings
        return trainable_position_encoding_forward(self.position_embeddings)


if __name__ == "__main__":
    key = jax.random.PRNGKey(0)

    # 1) Small module-consistent shape: index_dims=(4, 4) -> 16 rows x 128
    #    channels (lane-dense).  Single block, grid of 1.
    module = TrainablePositionEncodingJAX(index_dims=(4, 4), num_channel=128,
                                          key=key)
    out = jax.block_until_ready(module(pos=None))
    assert out.shape == (16, 128)
    assert out.dtype == module.position_embeddings.dtype
    np.testing.assert_array_equal(np.asarray(out),
                                  np.asarray(module.position_embeddings))

    # Zero-copy identity path (the truly optimal forward).
    out_zero = module(pos=None, materialize=False)
    assert out_zero is module.position_embeddings

    # 2) Multi-block path: 128 rows with a tiny per-buffer budget forces a
    #    4-step grid of 32-row, lane-dense blocks.
    emb2 = jax.random.normal(jax.random.PRNGKey(1), (128, 128), jnp.float32)
    out2 = jax.block_until_ready(
        trainable_position_encoding_forward(emb2, max_tile_bytes=16 * 1024))
    np.testing.assert_array_equal(np.asarray(out2), np.asarray(emb2))

    # 3) Aliased path: with a donated input buffer the output reuses it in
    #    place (no extra HBM allocation / writeback).
    donated = jnp.array(module.position_embeddings)  # private copy we can donate
    fwd_alias = jax.jit(
        functools.partial(trainable_position_encoding_forward,
                          alias_input=True),
        donate_argnums=(0,))
    out3 = jax.block_until_ready(fwd_alias(donated))
    np.testing.assert_array_equal(np.asarray(out3),
                                  np.asarray(module.position_embeddings))

    print("KERNEL_OK")
</pallas_src>

<mosaic_0001>
module attributes {stable_mosaic.version = 11 : i64} {
  func.func @_copy_kernel(%arg0: i32, %arg1: memref<16x128xf32, #tpu.memory_space<vmem>>, %arg2: memref<16x128xf32, #tpu.memory_space<vmem>>) attributes {dimension_semantics = [#tpu.dimension_semantics<parallel>], iteration_bounds = array<i64: 1>, scalar_prefetch = 0 : i64, scratch_operands = 0 : i64, tpu.core_type = #tpu.core_type<tc>, window_params = [{transform_indices = @transform_0, window_bounds = array<i64: 16, 128>}, {transform_indices = @transform_1, window_bounds = array<i64: 16, 128>}]} {
    %c0 = arith.constant 0 : index
    %c0_0 = arith.constant 0 : index
    %0 = vector.load %arg1[%c0, %c0_0] : memref<16x128xf32, #tpu.memory_space<vmem>>, vector<16x128xf32>
    %c0_1 = arith.constant 0 : index
    %c0_2 = arith.constant 0 : index
    %1 = vector.load %arg2[%c0_1, %c0_2] : memref<16x128xf32, #tpu.memory_space<vmem>>, vector<16x128xf32>
    tpu.vector_store %arg2[%c0_1, %c0_2], %0 {strides = array<i32>} : memref<16x128xf32, #tpu.memory_space<vmem>>, vector<16x128xf32>,
    return
  }
  func.func @transform_0(%arg0: i32) -> (i32, i32) {
    %c0_i32 = arith.constant 0 : i32
    %c0_i32_0 = arith.constant 0 : i32
    return %arg0, %c0_i32 : i32, i32
  }
  func.func @transform_1(%arg0: i32) -> (i32, i32) {
    %c0_i32 = arith.constant 0 : i32
    %c0_i32_0 = arith.constant 0 : i32
    return %arg0, %c0_i32 : i32, i32
  }
}

</mosaic_0001>

<bundles_post_ra>
// kernel: tpu_custom_call.1
= control target key start
LH: loop header
LB: loop body
LE: loop exit
PB: predicated region body
PF: predicated region fallthrough
CT: control target
= control target key end

     0   :  { %6 = vsyncpa [#allocation3], 0  ;;  %s124_s0 = inlined_call_operand.hbm [shape: f32[16,128], index: 0, kind: input, shape index: {}]   ;;  %s125_s1 = inlined_call_operand.hbm [shape: f32[16,128], index: 1, kind: output, shape index: {}]  }
   0x1   :  { %7 = vsyncpa [#allocation4], 0  ;;  %s12_s8 = sshll.u32 %s124_s0, 4  ;;  %s104_s9 = smov [#allocation2]   ;;  %s13_s8 = int_to_ptr.hbm [resolvable:$true] %s12_s8 }
   0x2   :  { %s14_s10 = sshll.u32 %s104_s9, 4  ;;  %s105_s11 = smov 128   ;;  %s15_s10 = int_to_ptr.vmem [resolvable:$true] %s14_s10 }
   0x3   :  { %s106_s12 = smov 8  }
   0x4   :  { %20 = dma.hbm_to_vmem [thread:$0]  %s13_s8, 256, %s15_s10, [#allocation3], %s105_s11, %s105_s11, %s106_s12  }
   0x5   :  { %100 = dma.done.wait [#allocation3], 256  }
   0x6   :  { %101 = vsyncadd [#allocation3], 4294967040  ;;  %s107_s13 = smov [#allocation5]   ;;  %s35_s17 = sshll.u32 %s125_s1, 4  ;;  %v25_v0 = vld [vmem:[#allocation2] sm:$0xff]  ;;  %v26_v1 = vld [vmem:[#allocation2 + $0x8] sm:$0xff]  ;;  %s36_s17 = int_to_ptr.hbm [resolvable:$true] %s35_s17 }
   0x7   :  { %s33_s14 = sshll.u32 %s107_s13, 4  ;;  %27 = vst [vmem:[#allocation5] sm:$0xff] %v25_v0  ;;  %s34_s14 = int_to_ptr.vmem [resolvable:$true] %s33_s14 }
   0x8   :  { %28 = vst [vmem:[#allocation5 + $0x8] sm:$0xff] %v26_v1 }
   0x9   :  { %41 = dma.vmem_to_hbm [thread:$0]  %s34_s14, 256, %s36_s17, [#allocation4], %s105_s11, %s105_s11, %s106_s12  }
   0xa   :  { %102 = dma.done.wait [#allocation4], 256  }
   0xb   :  { %103 = vsyncadd [#allocation4], 4294967040 }
   0xc   :  { %46 = vsyncpa [#allocation3], 1 }
   0xd   :  { %47 = vsyncpa [#allocation4], 1 }

</bundles_post_ra>
